<compile_context>
chip_gen: v7x
topology: tpu7x:2x2x1
jax: 0.10.0
libtpu: 0.0.40
codegen_flags: <defaults>
</compile_context>

<pallas_src>
import functools

import jax
import jax.numpy as jnp
import numpy as np
from jax import lax
from jax.experimental import pallas as pl
from jax.experimental.pallas import tpu as pltpu

BN_EPS = 1e-3


def _round_up(x, m):
    return (x + m - 1) // m * m


def _vmem_limit_bytes():
    """Generation-aware VMEM budget: ~3/4 of physical, capped, >= 32 MiB."""
    try:
        cap = pltpu.get_tpu_info().vmem_capacity_bytes
        return int(max(32 << 20, min(cap * 3 // 4, 96 << 20)))
    except Exception:
        return 48 << 20


def _const_spec(block_shape, index_map):
    """BlockSpec for constant-index operands: single-buffered (2nd buffer is waste)."""
    try:
        return pl.BlockSpec(block_shape, index_map, pipeline_mode=pl.Buffered(1))
    except Exception:  # older jax without pipeline_mode / Buffered
        return pl.BlockSpec(block_shape, index_map)


# ---------------------------------------------------------------------------
# Pass 1a: per-column sum / sum-of-squares of z = Q @ Wp  (BN batch statistics)
# Grid = (2 cores "parallel", steps "arbitrary"); per-core (8, Np) partials.
# ---------------------------------------------------------------------------
def _stats_kernel(q_ref, w_ref, sum_ref, sumsq_ref):
    z = jnp.dot(q_ref[...], w_ref[...], preferred_element_type=jnp.float32)

    @pl.when(pl.program_id(1) == 0)
    def _():
        sum_ref[...] = jnp.zeros_like(sum_ref)
        sumsq_ref[...] = jnp.zeros_like(sumsq_ref)

    zr = z.reshape(-1, 8, z.shape[-1])          # sublane-partial reduction
    sum_ref[...] += jnp.sum(zr, axis=0)
    sumsq_ref[...] += jnp.sum(zr * zr, axis=0)


# ---------------------------------------------------------------------------
# Pass 1b: same statistics, but also writes z (bf16) so pass 2 needs no matmul.
# ---------------------------------------------------------------------------
def _stats_write_kernel(q_ref, w_ref, z_ref, sum_ref, sumsq_ref):
    z = jnp.dot(q_ref[...], w_ref[...], preferred_element_type=jnp.float32)
    z_ref[...] = z.astype(z_ref.dtype)

    @pl.when(pl.program_id(1) == 0)
    def _():
        sum_ref[...] = jnp.zeros_like(sum_ref)
        sumsq_ref[...] = jnp.zeros_like(sumsq_ref)

    zr = z.reshape(-1, 8, z.shape[-1])
    sum_ref[...] += jnp.sum(zr, axis=0)
    sumsq_ref[...] += jnp.sum(zr * zr, axis=0)


# ---------------------------------------------------------------------------
# Pass 2a (recompute path): z = Q @ W2 (BN scale pre-folded into W2) + shift, ReLU.
# ---------------------------------------------------------------------------
def _recompute_apply_kernel(q_ref, w2_ref, shift_ref, o_ref):
    z = jnp.dot(q_ref[...], w2_ref[...], preferred_element_type=jnp.float32)
    o_ref[...] = jnp.maximum(z + shift_ref[...], 0.0).astype(o_ref.dtype)


# ---------------------------------------------------------------------------
# Pass 2b (z-writeback path): matmul-free affine + ReLU over the stored z.
# ---------------------------------------------------------------------------
def _affine_apply_kernel(z_ref, scale_ref, shift_ref, o_ref):
    z = z_ref[...].astype(jnp.float32)
    o_ref[...] = jnp.maximum(z * scale_ref[...] + shift_ref[...], 0.0).astype(o_ref.dtype)


def upsampler_block(x_nchw, weight, bias, gamma, beta, *, tile_m=1024):
    """ConvTranspose2d(3, stride=2, padding=1, output_padding=1) + BN + ReLU.

    x_nchw: (N, Cin, H, W); weight: (Cin, Cout, 3, 3) (PyTorch ConvTranspose2d
    layout); bias/gamma/beta: (Cout,).  Returns (N, Cout, 2H, 2W) float32.

    Note: Cout is padded to a multiple of 32 per phase (Np = 4*Cp multiple of 128
    for lane-dense stores); for Cout far below 32 a large fraction of MXU columns
    and output writeback is padding waste — acceptable at production channel
    counts, wasteful at toy sizes.
    """
    # ConvTranspose bias is cancelled by batch-stat BatchNorm (BN subtracts the
    # per-channel batch mean), so it never enters the kernels.
    del bias
    # TODO(synk): eval-mode BN (running_mean/running_var) would need a separate
    # path that adds the conv bias and uses the stored statistics.
    N, Cin, H, W = x_nchw.shape
    Cout = weight.shape[1]
    OH, OW = 2 * H, 2 * W

    Cin_p = _round_up(Cin, 32)      # pad taps so K is a multiple of 128
    Cp = _round_up(Cout, 32)        # per-phase padded output channels
    Kp = 4 * Cin_p                  # 4 input taps feed each output 2x2 block
    Np = 4 * Cp                     # packed output width, multiple of 128

    M = N * H * W
    gran = 256                      # keep bf16 Q tiles sublane-packed / full MXU M
    TM = max(gran, _round_up(min(tile_m, _round_up(M, gran)), gran))
    Mp = _round_up(M, 2 * TM)       # even #tiles -> splits across 2 v7x cores
    n_tiles = Mp // TM
    steps = n_tiles // 2            # arbitrary-axis steps per core

    # ---- glue (XLA data movement): quad-tap gather in NHWC, cast to bf16 ----
    x = jnp.transpose(x_nchw, (0, 2, 3, 1)).astype(jnp.bfloat16)       # (N,H,W,Cin)
    xp = jnp.pad(x, ((0, 0), (0, 1), (0, 1), (0, Cin_p - Cin)))        # +1 row/col, +chan pad
    q = jnp.concatenate(
        [xp[:, ty:ty + H, tx:tx + W, :] for ty in (0, 1) for tx in (0, 1)],
        axis=-1).reshape(M, Kp)
    # Padded rows are all-zero -> contribute 0 to both sums, so no masking needed.
    q = jnp.pad(q, ((0, Mp - M), (0, 0)))

    # ---- packed polyphase weight:
    #   Wp[tap*Cin_p + ci, phase*Cp + co] = weight[ci, co, ky, kx]
    #   with tap = ty*2+tx, phase = py*2+px, ky = py+1-2*ty, kx = px+1-2*tx.
    w32 = weight.astype(jnp.float32)
    wp = jnp.zeros((Kp, Np), jnp.float32)
    for py in (0, 1):
        for px in (0, 1):
            phase = py * 2 + px
            for ty in (0, 1):
                ky = py + 1 - 2 * ty
                if not 0 <= ky <= 2:
                    continue
                for tx in (0, 1):
                    kx = px + 1 - 2 * tx
                    if not 0 <= kx <= 2:
                        continue
                    tap = ty * 2 + tx
                    wp = wp.at[tap * Cin_p:tap * Cin_p + Cin,
                               phase * Cp:phase * Cp + Cout].set(w32[:, :, ky, kx])
    wp_bf16 = wp.astype(jnp.bfloat16)

    vmem = _vmem_limit_bytes()
    cp_stats = pltpu.CompilerParams(dimension_semantics=("parallel", "arbitrary"),
                                    vmem_limit_bytes=vmem)
    cp_apply = pltpu.CompilerParams(dimension_semantics=("parallel",),
                                    vmem_limit_bytes=vmem)

    # When Cin >~ 2*Cout, writing z once (bf16) beats re-reading Q + re-matmul.
    z_writeback = Kp >= 2 * Np

    # ---- pass 1: BN batch statistics over z = Q @ Wp --------------------------
    stats_out_shapes = [jax.ShapeDtypeStruct((16, Np), jnp.float32),
                        jax.ShapeDtypeStruct((16, Np), jnp.float32)]
    stats_out_specs = [pl.BlockSpec((8, Np), lambda c, i: (c, 0)),
                       pl.BlockSpec((8, Np), lambda c, i: (c, 0))]
    q_spec1 = pl.BlockSpec((TM, Kp), lambda c, i: (c * steps + i, 0))
    w_spec1 = _const_spec((Kp, Np), lambda c, i: (0, 0))

    if z_writeback:
        cost1 = pl.CostEstimate(
            flops=2 * Mp * Kp * Np, transcendentals=0,
            bytes_accessed=Mp * Kp * 2 + Kp * Np * 2 + Mp * Np * 2 + 2 * 16 * Np * 4)
        z_flat, sum_rows, sumsq_rows = pl.pallas_call(
            _stats_write_kernel,
            out_shape=[jax.ShapeDtypeStruct((Mp, Np), jnp.bfloat16)] + stats_out_shapes,
            grid_spec=pltpu.PrefetchScalarGridSpec(
                num_scalar_prefetch=0, grid=(2, steps),
                in_specs=[q_spec1, w_spec1],
                out_specs=[pl.BlockSpec((TM, Np), lambda c, i: (c * steps + i, 0))]
                          + stats_out_specs),
            compiler_params=cp_stats,
            cost_estimate=cost1,
        )(q, wp_bf16)
    else:
        cost1 = pl.CostEstimate(
            flops=2 * Mp * Kp * Np, transcendentals=0,
            bytes_accessed=Mp * Kp * 2 + Kp * Np * 2 + 2 * 16 * Np * 4)
        sum_rows, sumsq_rows = pl.pallas_call(
            _stats_kernel,
            out_shape=stats_out_shapes,
            grid_spec=pltpu.PrefetchScalarGridSpec(
                num_scalar_prefetch=0, grid=(2, steps),
                in_specs=[q_spec1, w_spec1],
                out_specs=stats_out_specs),
            compiler_params=cp_stats,
            cost_estimate=cost1,
        )(q, wp_bf16)

    # ---- fold BN into per-column scale/shift (tiny per-channel math in XLA) ---
    # BN channel co is shared by its 4 phase columns -> reduce over phases.
    cnt = jnp.float32(4 * M)                       # = N * OH * OW
    sum_z = jnp.sum(sum_rows, axis=0)              # 2 cores x 8 sublane partials
    sumsq_z = jnp.sum(sumsq_rows, axis=0)
    sum_c = jnp.sum(sum_z.reshape(4, Cp), axis=0)
    sumsq_c = jnp.sum(sumsq_z.reshape(4, Cp), axis=0)
    mean_c = sum_c / cnt
    # Biased variance (training-mode BN); clamp guards E[z^2]-E[z]^2 cancellation.
    # TODO(synk): for very large spatial sizes a shifted / Welford accumulation
    # would be numerically safer than E[z^2]-E[z]^2.
    var_c = jnp.maximum(sumsq_c / cnt - mean_c * mean_c, 0.0)
    gamma_c = jnp.zeros((Cp,), jnp.float32).at[:Cout].set(gamma.astype(jnp.float32))
    beta_c = jnp.zeros((Cp,), jnp.float32).at[:Cout].set(beta.astype(jnp.float32))
    scale_c = gamma_c * lax.rsqrt(var_c + BN_EPS)
    shift_c = beta_c - mean_c * scale_c
    scale = jnp.tile(scale_c, 4).reshape(1, Np)    # column order = phase*Cp + co
    shift = jnp.tile(shift_c, 4).reshape(1, Np)

    # ---- pass 2: BN affine + ReLU, lane-dense (TM, Np) bf16 tiles -------------
    if z_writeback:
        cost2 = pl.CostEstimate(
            flops=2 * Mp * Np, transcendentals=0,
            bytes_accessed=2 * Mp * Np * 2 + 2 * Np * 4)
        out_flat = pl.pallas_call(
            _affine_apply_kernel,
            out_shape=jax.ShapeDtypeStruct((Mp, Np), jnp.bfloat16),
            grid_spec=pltpu.PrefetchScalarGridSpec(
                num_scalar_prefetch=0, grid=(n_tiles,),
                in_specs=[pl.BlockSpec((TM, Np), lambda i: (i, 0)),
                          _const_spec((1, Np), lambda i: (0, 0)),
                          _const_spec((1, Np), lambda i: (0, 0))],
                out_specs=pl.BlockSpec((TM, Np), lambda i: (i, 0))),
            compiler_params=cp_apply,
            cost_estimate=cost2,
        )(z_flat, scale, shift)
    else:
        # Fold BN scale into the bf16 weights; epilogue becomes add + ReLU only.
        w2_bf16 = (wp * scale).astype(jnp.bfloat16)
        cost2 = pl.CostEstimate(
            flops=2 * Mp * Kp * Np, transcendentals=0,
            bytes_accessed=Mp * Kp * 2 + Kp * Np * 2 + Np * 4 + Mp * Np * 2)
        out_flat = pl.pallas_call(
            _recompute_apply_kernel,
            out_shape=jax.ShapeDtypeStruct((Mp, Np), jnp.bfloat16),
            grid_spec=pltpu.PrefetchScalarGridSpec(
                num_scalar_prefetch=0, grid=(n_tiles,),
                in_specs=[pl.BlockSpec((TM, Kp), lambda i: (i, 0)),
                          _const_spec((Kp, Np), lambda i: (0, 0)),
                          _const_spec((1, Np), lambda i: (0, 0))],
                out_specs=pl.BlockSpec((TM, Np), lambda i: (i, 0))),
            compiler_params=cp_apply,
            cost_estimate=cost2,
        )(q, w2_bf16, shift)

    # ---- glue: unpack the 2x2 phases back to (N, Cout, OH, OW), stay bf16 -----
    out = out_flat[:M].reshape(N, H, W, 4, Cp)[..., :Cout]
    out = out.reshape(N, H, W, 2, 2, Cout).transpose(0, 1, 3, 2, 4, 5)
    out = out.reshape(N, OH, OW, Cout)
    # TODO(synk): surrounding model could stay NHWC (and bf16) and skip this
    # layout round-trip and the final f32 cast.
    return jnp.transpose(out, (0, 3, 1, 2)).astype(jnp.float32)


def upsampler_block_ref(x_nchw, weight, bias, gamma, beta):
    """Pure-JAX reference with identical semantics (for validation)."""
    w_conv = jnp.transpose(jnp.flip(weight, axis=(2, 3)), (1, 0, 2, 3))  # OIHW
    y = lax.conv_general_dilated(
        x_nchw, w_conv, window_strides=(1, 1), padding=((1, 2), (1, 2)),
        lhs_dilation=(2, 2), rhs_dilation=(1, 1),
        dimension_numbers=("NCHW", "OIHW", "NCHW"),
        precision=lax.Precision.HIGHEST)
    y = y + bias[None, :, None, None]
    mean = jnp.mean(y, axis=(0, 2, 3), keepdims=True)
    var = jnp.mean(jnp.square(y - mean), axis=(0, 2, 3), keepdims=True)
    y = (y - mean) * lax.rsqrt(var + BN_EPS) * gamma[None, :, None, None] \
        + beta[None, :, None, None]
    return jnp.maximum(y, 0.0)


if __name__ == "__main__":
    def run_case(N, Cin, Cout, H, W, tile_m, key):
        k_x, k_w, k_b, k_g, k_beta = jax.random.split(key, 5)
        x = jax.random.normal(k_x, (N, Cin, H, W), jnp.float32)
        # deterministic synthetic parameters (shapes from UpsamplerBlock.__init__)
        weight = jax.random.normal(k_w, (Cin, Cout, 3, 3), jnp.float32) * 0.1
        bias = jax.random.normal(k_b, (Cout,), jnp.float32) * 0.1
        gamma = jax.random.uniform(k_g, (Cout,), jnp.float32, 0.5, 1.5)
        beta = jax.random.normal(k_beta, (Cout,), jnp.float32) * 0.1

        fwd = jax.jit(functools.partial(upsampler_block, tile_m=tile_m))
        out = jax.block_until_ready(fwd(x, weight, bias, gamma, beta))
        ref = jax.block_until_ready(upsampler_block_ref(x, weight, bias, gamma, beta))
        assert out.shape == (N, Cout, 2 * H, 2 * W)
        np.testing.assert_allclose(np.asarray(out), np.asarray(ref),
                                   rtol=2e-2, atol=2.5e-2)

    k1, k2 = jax.random.split(jax.random.PRNGKey(0))
    # Recompute path (Cin < 2*Cout): 2 M-tiles exercise the pipeline + parallel axis.
    run_case(2, 4, 8, 16, 16, 256, k1)
    # z-writeback path (Cin >= 2*Cout): 4 M-tiles -> 2 accumulation steps per core.
    run_case(1, 64, 8, 24, 24, 256, k2)
    print("KERNEL_OK")
</pallas_src>

<mosaic_0001>
module attributes {stable_mosaic.version = 11 : i64} {
  func.func @_stats_kernel(%arg0: i32, %arg1: i32, %arg2: memref<256x128xbf16, #tpu.memory_space<vmem>>, %arg3: memref<128x128xbf16, #tpu.memory_space<vmem>>, %arg4: memref<8x128xf32, #tpu.memory_space<vmem>>, %arg5: memref<8x128xf32, #tpu.memory_space<vmem>>) attributes {dimension_semantics = [#tpu.dimension_semantics<parallel>, #tpu.dimension_semantics<arbitrary>], iteration_bounds = array<i64: 2, 1>, scalar_prefetch = 0 : i64, scratch_operands = 0 : i64, tpu.core_type = #tpu.core_type<tc>, window_params = [{transform_indices = @transform_0, window_bounds = array<i64: 256, 128>}, {pipeline_mode = #tpu.pipeline_mode<synchronous>, transform_indices = @transform_1, window_bounds = array<i64: 128, 128>}, {transform_indices = @transform_2, window_bounds = array<i64: 8, 128>}, {transform_indices = @transform_3, window_bounds = array<i64: 8, 128>}]} {
    %c0 = arith.constant 0 : index
    %c0_0 = arith.constant 0 : index
    %0 = vector.load %arg2[%c0, %c0_0] : memref<256x128xbf16, #tpu.memory_space<vmem>>, vector<256x128xbf16>
    %c0_1 = arith.constant 0 : index
    %c0_2 = arith.constant 0 : index
    %1 = vector.load %arg3[%c0_1, %c0_2] : memref<128x128xbf16, #tpu.memory_space<vmem>>, vector<128x128xbf16>
    %cst = arith.constant dense<0.000000e+00> : vector<256x128xf32>
    %2 = tpu.matmul %0, %1, %cst {dimension_numbers = #tpu.dot_dimension_numbers<[1], [0], [0], [1], [0, 0, 1, 1], [], []>} : vector<256x128xbf16>, vector<128x128xbf16>, vector<256x128xf32> -> vector<256x128xf32>
    %c0_i32 = arith.constant 0 : i32
    %3 = arith.cmpi eq, %arg1, %c0_i32 : i32
    %4 = arith.extui %3 : i1 to i32
    %c0_i32_3 = arith.constant 0 : i32
    %5 = arith.cmpi ne, %4, %c0_i32_3 : i32
    scf.if %5 {
      %cst_14 = arith.constant 0.000000e+00 : f32
      %16 = vector.broadcast %cst_14 : f32 to vector<8x128xf32>
      %c0_15 = arith.constant 0 : index
      %c0_16 = arith.constant 0 : index
      %17 = vector.load %arg4[%c0_15, %c0_16] : memref<8x128xf32, #tpu.memory_space<vmem>>, vector<8x128xf32>
      tpu.vector_store %arg4[%c0_15, %c0_16], %16 {strides = array<i32>} : memref<8x128xf32, #tpu.memory_space<vmem>>, vector<8x128xf32>,
      %cst_17 = arith.constant 0.000000e+00 : f32
      %18 = vector.broadcast %cst_17 : f32 to vector<8x128xf32>
      %c0_18 = arith.constant 0 : index
      %c0_19 = arith.constant 0 : index
      %19 = vector.load %arg5[%c0_18, %c0_19] : memref<8x128xf32, #tpu.memory_space<vmem>>, vector<8x128xf32>
      tpu.vector_store %arg5[%c0_18, %c0_19], %18 {strides = array<i32>} : memref<8x128xf32, #tpu.memory_space<vmem>>, vector<8x128xf32>,
    } else {
    }
    %6 = vector.shape_cast %2 : vector<256x128xf32> to vector<32x8x128xf32>
    %c0_4 = arith.constant 0 : index
    %c0_5 = arith.constant 0 : index
    %7 = vector.load %arg4[%c0_4, %c0_5] : memref<8x128xf32, #tpu.memory_space<vmem>>, vector<8x128xf32>
    %cst_6 = arith.constant dense<0.000000e+00> : vector<8x128xf32>
    %8 = vector.multi_reduction <add>, %6, %cst_6 [0] : vector<32x8x128xf32> to vector<8x128xf32>
    %9 = arith.addf %7, %8 : vector<8x128xf32>
    %c0_7 = arith.constant 0 : index
    %c0_8 = arith.constant 0 : index
    %10 = vector.load %arg4[%c0_7, %c0_8] : memref<8x128xf32, #tpu.memory_space<vmem>>, vector<8x128xf32>
    tpu.vector_store %arg4[%c0_7, %c0_8], %9 {strides = array<i32>} : memref<8x128xf32, #tpu.memory_space<vmem>>, vector<8x128xf32>,
    %c0_9 = arith.constant 0 : index
    %c0_10 = arith.constant 0 : index
    %11 = vector.load %arg5[%c0_9, %c0_10] : memref<8x128xf32, #tpu.memory_space<vmem>>, vector<8x128xf32>
    %12 = arith.mulf %6, %6 : vector<32x8x128xf32>
    %cst_11 = arith.constant dense<0.000000e+00> : vector<8x128xf32>
    %13 = vector.multi_reduction <add>, %12, %cst_11 [0] : vector<32x8x128xf32> to vector<8x128xf32>
    %14 = arith.addf %11, %13 : vector<8x128xf32>
    %c0_12 = arith.constant 0 : index
    %c0_13 = arith.constant 0 : index
    %15 = vector.load %arg5[%c0_12, %c0_13] : memref<8x128xf32, #tpu.memory_space<vmem>>, vector<8x128xf32>
    tpu.vector_store %arg5[%c0_12, %c0_13], %14 {strides = array<i32>} : memref<8x128xf32, #tpu.memory_space<vmem>>, vector<8x128xf32>,
    return
  }
  func.func @transform_0(%arg0: i32, %arg1: i32) -> (i32, i32) {
    %c1_i32 = arith.constant 1 : i32
    %0 = arith.muli %arg0, %c1_i32 : i32
    %1 = arith.addi %0, %arg1 : i32
    %c0_i32 = arith.constant 0 : i32
    %c0_i32_0 = arith.constant 0 : i32
    return %1, %c0_i32 : i32, i32
  }
  func.func @transform_1(%arg0: i32, %arg1: i32) -> (i32, i32) {
    %c0_i32 = arith.constant 0 : i32
    %c0_i32_0 = arith.constant 0 : i32
    %c0_i32_1 = arith.constant 0 : i32
    return %c0_i32, %c0_i32_0 : i32, i32
  }
  func.func @transform_2(%arg0: i32, %arg1: i32) -> (i32, i32) {
    %c0_i32 = arith.constant 0 : i32
    %c0_i32_0 = arith.constant 0 : i32
    return %arg0, %c0_i32 : i32, i32
  }
  func.func @transform_3(%arg0: i32, %arg1: i32) -> (i32, i32) {
    %c0_i32 = arith.constant 0 : i32
    %c0_i32_0 = arith.constant 0 : i32
    return %arg0, %c0_i32 : i32, i32
  }
}

module attributes {stable_mosaic.version = 11 : i64} {
  func.func @_recompute_apply_kernel(%arg0: i32, %arg1: memref<256x128xbf16, #tpu.memory_space<vmem>>, %arg2: memref<128x128xbf16, #tpu.memory_space<vmem>>, %arg3: memref<1x128xf32, #tpu.memory_space<vmem>>, %arg4: memref<256x128xbf16, #tpu.memory_space<vmem>>) attributes {dimension_semantics = [#tpu.dimension_semantics<parallel>], iteration_bounds = array<i64: 2>, scalar_prefetch = 0 : i64, scratch_operands = 0 : i64, tpu.core_type = #tpu.core_type<tc>, window_params = [{transform_indices = @transform_0, window_bounds = array<i64: 256, 128>}, {pipeline_mode = #tpu.pipeline_mode<synchronous>, transform_indices = @transform_1, window_bounds = array<i64: 128, 128>}, {pipeline_mode = #tpu.pipeline_mode<synchronous>, transform_indices = @transform_2, window_bounds = array<i64: 1, 128>}, {transform_indices = @transform_3, window_bounds = array<i64: 256, 128>}]} {
    %c0 = arith.constant 0 : index
    %c0_0 = arith.constant 0 : index
    %0 = vector.load %arg1[%c0, %c0_0] : memref<256x128xbf16, #tpu.memory_space<vmem>>, vector<256x128xbf16>
    %c0_1 = arith.constant 0 : index
    %c0_2 = arith.constant 0 : index
    %1 = vector.load %arg2[%c0_1, %c0_2] : memref<128x128xbf16, #tpu.memory_space<vmem>>, vector<128x128xbf16>
    %cst = arith.constant dense<0.000000e+00> : vector<256x128xf32>
    %2 = tpu.matmul %0, %1, %cst {dimension_numbers = #tpu.dot_dimension_numbers<[1], [0], [0], [1], [0, 0, 1, 1], [], []>} : vector<256x128xbf16>, vector<128x128xbf16>, vector<256x128xf32> -> vector<256x128xf32>
    %c0_3 = arith.constant 0 : index
    %c0_4 = arith.constant 0 : index
    %3 = vector.load %arg3[%c0_3, %c0_4] : memref<1x128xf32, #tpu.memory_space<vmem>>, vector<1x128xf32>
    %4 = vector.broadcast %3 : vector<1x128xf32> to vector<256x128xf32>
    %5 = arith.addf %2, %4 : vector<256x128xf32>
    %cst_5 = arith.constant 0.000000e+00 : f32
    %6 = vector.broadcast %cst_5 : f32 to vector<256x128xf32>
    %7 = arith.maximumf %5, %6 : vector<256x128xf32>
    %8 = arith.truncf %7 : vector<256x128xf32> to vector<256x128xbf16>
    %c0_6 = arith.constant 0 : index
    %c0_7 = arith.constant 0 : index
    %9 = vector.load %arg4[%c0_6, %c0_7] : memref<256x128xbf16, #tpu.memory_space<vmem>>, vector<256x128xbf16>
    tpu.vector_store %arg4[%c0_6, %c0_7], %8 {strides = array<i32>} : memref<256x128xbf16, #tpu.memory_space<vmem>>, vector<256x128xbf16>,
    return
  }
  func.func @transform_0(%arg0: i32) -> (i32, i32) {
    %c0_i32 = arith.constant 0 : i32
    %c0_i32_0 = arith.constant 0 : i32
    return %arg0, %c0_i32 : i32, i32
  }
  func.func @transform_1(%arg0: i32) -> (i32, i32) {
    %c0_i32 = arith.constant 0 : i32
    %c0_i32_0 = arith.constant 0 : i32
    %c0_i32_1 = arith.constant 0 : i32
    return %c0_i32, %c0_i32_0 : i32, i32
  }
  func.func @transform_2(%arg0: i32) -> (i32, i32) {
    %c0_i32 = arith.constant 0 : i32
    %c0_i32_0 = arith.constant 0 : i32
    %c0_i32_1 = arith.constant 0 : i32
    return %c0_i32, %c0_i32_0 : i32, i32
  }
  func.func @transform_3(%arg0: i32) -> (i32, i32) {
    %c0_i32 = arith.constant 0 : i32
    %c0_i32_0 = arith.constant 0 : i32
    return %arg0, %c0_i32 : i32, i32
  }
}

</mosaic_0001>

<bundles_post_ra>
// kernel: tile.18
= control target key start
LH: loop header
LB: loop body
LE: loop exit
PB: predicated region body
PF: predicated region fallthrough
CT: control target
= control target key end

     0   :  { %s22_s0 = inlined_call_operand.vmem [shape: f32[32], index: 0, kind: input, shape index: {}]   ;;  %s23_s1 = inlined_call_operand.vmem [shape: f32[4,32], index: 1, kind: output, shape index: {}]  }
   0x1   :  { %v4_v0 = vld [vmem:[%s22_s0] ss:$0 sm:$0xff] }
   0x2   :  { %5 = vst [vmem:[%s23_s1] sm:$0xf] %v4_v0 }

// kernel: tile.19
= control target key start
LH: loop header
LB: loop body
LE: loop exit
PB: predicated region body
PF: predicated region fallthrough
CT: control target
= control target key end

     0   :  { %vm7_vm0 = vcmask 261120   ;;  %s37_s8 = smov 32   ;;  %s38_s9 = smov 64   ;;  %vm13_vm1 = vcmask 1048320   ;;  %vm19_vm2 = vcmask 785920   ;;  %vm25_vm3 = vcmask 523520   ;;  %s55_s0 = inlined_call_operand.vmem [shape: f32[4,32], index: 0, kind: input, shape index: {}]   ;;  %s56_s1 = inlined_call_operand.vmem [shape: f32[1,128], index: 1, kind: output, shape index: {}]  }
   0x1   :  { %v4_v0 = vld [vmem:[%s55_s0] sm:$0xf]  ;;  %s36_s0 = smov 96  }
   0x2   :  { %5 = vst [vmem:[#allocation1] sm:$0xf] %v4_v0 }
   0x9   :  { %v10_v1 = vld [vmem:[#allocation1 + $0x3] sm:$0x1]   ;;  %v22_v2 = vld [vmem:[#allocation1 + $0x1] sm:$0x1]   ;;  %v6_v3 = vld [vmem:[#allocation1] sm:$0x1]  }
   0xa   :  { %11 = vrot.lane.b32.xlu0 %v10_v1, %s36_s0  ;;  %23 = vrot.lane.b32.xlu1 %v22_v2, %s37_s8  ;;  %v16_v4 = vld [vmem:[#allocation1 + $0x2] sm:$0x1]   ;;  %8 = vst.msk [vmem:[#allocation0] sm:$0x1] %vm7_vm0, %v6_v3  }
   0xe   :  { %17 = vrot.lane.b32.xlu0 %v16_v4, %s38_s9 }
  0x7c   :  { %v12_v5 = vpop.permute.xlu0 %11   ;;  %v24_v6 = vpop.permute.xlu1 %23  }
  0x7d   :  { %14 = vst.msk [vmem:[#allocation0] sm:$0x1] %vm13_vm1, %v12_v5  }
  0x80   :  { %v18_v7 = vpop.permute.xlu0 %17  }
  0x81   :  { %20 = vst.msk [vmem:[#allocation0] sm:$0x1] %vm19_vm2, %v18_v7  }
  0x82   :  { %26 = vst.msk [vmem:[#allocation0] sm:$0x1] %vm25_vm3, %v24_v6  }
  0x89   :  { %v30_v8 = vld [vmem:[#allocation0] sm:$0x1] }
  0x8a   :  { %32 = vst [vmem:[%s56_s1] sm:$0x1] %v30_v8 }

// kernel: mul.11
= control target key start
LH: loop header
LB: loop body
LE: loop exit
PB: predicated region body
PF: predicated region fallthrough
CT: control target
= control target key end

     0   :  { %vm7_vm0 = vcmask 261120   ;;  %s37_s8 = smov 32   ;;  %s38_s9 = smov 64   ;;  %vm13_vm1 = vcmask 1048320   ;;  %vm19_vm2 = vcmask 785920   ;;  %vm25_vm3 = vcmask 523520   ;;  %s55_s0 = inlined_call_operand.vmem [shape: f32[4,32], index: 0, kind: input, shape index: {}]   ;;  %s56_s1 = inlined_call_operand.vmem [shape: f32[128], index: 1, kind: output, shape index: {}]  }
   0x1   :  { %v4_v0 = vld [vmem:[%s55_s0] sm:$0xf]  ;;  %s36_s0 = smov 96  }
   0x2   :  { %5 = vst [vmem:[#allocation1] sm:$0xf] %v4_v0 }
   0x9   :  { %v10_v1 = vld [vmem:[#allocation1 + $0x3] sm:$0x1]   ;;  %v22_v2 = vld [vmem:[#allocation1 + $0x1] sm:$0x1]   ;;  %v6_v3 = vld [vmem:[#allocation1] sm:$0x1]  }
   0xa   :  { %11 = vrot.lane.b32.xlu0 %v10_v1, %s36_s0  ;;  %23 = vrot.lane.b32.xlu1 %v22_v2, %s37_s8  ;;  %v16_v4 = vld [vmem:[#allocation1 + $0x2] sm:$0x1]   ;;  %8 = vst.msk [vmem:[#allocation0] sm:$0x1] %vm7_vm0, %v6_v3  }
   0xe   :  { %17 = vrot.lane.b32.xlu0 %v16_v4, %s38_s9 }
  0x7c   :  { %v12_v5 = vpop.permute.xlu0 %11   ;;  %v24_v6 = vpop.permute.xlu1 %23  }
  0x7d   :  { %14 = vst.msk [vmem:[#allocation0] sm:$0x1] %vm13_vm1, %v12_v5  }
  0x80   :  { %v18_v7 = vpop.permute.xlu0 %17  }
  0x81   :  { %20 = vst.msk [vmem:[#allocation0] sm:$0x1] %vm19_vm2, %v18_v7  }
  0x82   :  { %26 = vst.msk [vmem:[#allocation0] sm:$0x1] %vm25_vm3, %v24_v6  }
  0x89   :  { %v30_v8 = vld [vmem:[#allocation0] sm:$0x1] }
  0x8a   :  { %32 = vst [vmem:[%s56_s1] sm:$0x1] %v30_v8 }

// kernel: upsampler_block.2
= control target key start
LH: loop header
LB: loop body
LE: loop exit
PB: predicated region body
PF: predicated region fallthrough
CT: control target
= control target key end

     0   :  { %s969_s12 = smov 0   ;;  %s971_s13 = smov 0   ;;  %s1107_s0 = inlined_call_operand.vmem [shape: bf16[512,128], index: 0, kind: input, shape index: {}]   ;;  %s1108_s1 = inlined_call_operand.vmem [shape: bf16[128,128], index: 1, kind: input, shape index: {}]   ;;  %s1109_s2 = inlined_call_operand.vmem [shape: f32[16,128], index: 2, kind: output, shape index: {0}]   ;;  %s1110_s3 = inlined_call_operand.vmem [shape: f32[16,128], index: 3, kind: output, shape index: {1}]  }
   0x1   :  { %s973_s14 = smov 0  }
   0x2 LB: > { %s26_s15 = sadd.s32 1, %s943_s13  ;;  %p757_p0 = scmp.ge.s32.totalorder %s947_s14, 1  ;;  %s947_s14 = sphi %s973_s14, %s14_s14   ;;  %s943_s13 = sphi %s971_s13, %s1112_s13   ;;  %s939_s12 = sphi %s969_s12, %s1111_s12  }
   0x3   : > { %p28_p1 = scmp.ge.s32.totalorder %s26_s15, 2  ;;  %p157_p2 = scmp.lt.s32.totalorder %s947_s14, 3 }
   0x5   : > { %s1114_s15 = smov (%p28_p1, %s26_s15), 0  ;;  %p158_p3 = pnand %p757_p0, %p157_p2 }
   0x6   : > { %v901_v0 = vld [vmem:[%s1108_s1] sm:$0xff] (!%p158_p3)   ;;  %s758_s18 = sshll.u32 (!%p158_p3), %s939_s12, 5  ;;  %v902_v1 = vld [vmem:[%s1108_s1 + $0x8] sm:$0xff] (!%p158_p3)   ;;  %v903_v2 = vld [vmem:[%s1108_s1 + $0x10] sm:$0xff] (!%p158_p3)   ;;  %p193_p5 = scmp.lt.s32.totalorder (!%p158_p3), %s939_s12, 1 }
   0x7   : > { %161 = sbr.rel (%p158_p3) target bundleno = 319 (0x13f), region = 28  ;;  %p187_p4 = scmp.lt.s32.totalorder (!%p158_p3), %s758_s18, 63  ;;  %812 = vmatprep.subr.bf16.mxu0 (!%p158_p3), %v901_v0  ;;  %860 = vmatprep.subr.bf16.mxu1 (!%p158_p3), %v901_v0  ;;  %v904_v3 = vld [vmem:[%s1108_s1 + $0x18] sm:$0xff] (!%p158_p3)   ;;  %v905_v5 = vld [vmem:[%s1108_s1 + $0x20] sm:$0xff] (!%p158_p3)   ;;  %v906_v6 = vld [vmem:[%s1108_s1 + $0x28] sm:$0xff] (!%p158_p3)  }
   0x8   : > { %813 = vmatpush3.bf16.msra.mxu0 (!%p158_p3), %v901_v0  ;;  %868 = vmatpush3.bf16.msra.mxu1 (!%p158_p3), %v901_v0  ;;  %v907_v8 = vld [vmem:[%s1108_s1 + $0x30] sm:$0xff] (!%p158_p3)   ;;  %v908_v9 = vld [vmem:[%s1108_s1 + $0x38] sm:$0xff] (!%p158_p3)  }
   0x9   : > { %814 = vmatprep.subr.bf16.mxu0 (!%p158_p3), %v902_v1  ;;  %861 = vmatprep.subr.bf16.mxu1 (!%p158_p3), %v902_v1 }
   0xc   : > { %815 = vmatpush3.bf16.msra.mxu0 (!%p158_p3), %v902_v1  ;;  %869 = vmatpush3.bf16.msra.mxu1 (!%p158_p3), %v902_v1 }
   0xd   : > { %816 = vmatprep.subr.bf16.mxu0 (!%p158_p3), %v903_v2  ;;  %862 = vmatprep.subr.bf16.mxu1 (!%p158_p3), %v903_v2 }
   0xe   : > { %s1116_s18 = smov (!%p187_p4, %s758_s18), 63  ;;  %s1118_s12 = smov (!%p193_p5, %s939_s12), 1 }
   0xf   : > { %s759_s23 = sshll.u32 %s1116_s18, 2  ;;  %s760_s10 = sshll.u32 %s1118_s12, 3 }
  0x10   : > { %s1002_s26 = scalar_lea.vmem %s1107_s0, %s759_s23  ;;  %817 = vmatpush3.bf16.msra.mxu0 %v903_v2  ;;  %870 = vmatpush3.bf16.msra.mxu1 %v903_v2  ;;  %s196_s17 = scalar_lea.vmem %s1109_s2, %s760_s10 }
  0x11   : > { %v909_v4 = vld [vmem:[%s1002_s26] sm:$0xff]   ;;  %818 = vmatprep.subr.bf16.mxu0 %v904_v3  ;;  %863 = vmatprep.subr.bf16.mxu1 %v904_v3  ;;  %v910_v10 = vld [vmem:[%s1002_s26 + $0x8] sm:$0xff]   ;;  %v911_v12 = vld [vmem:[%s1002_s26 + $0x10] sm:$0xff]   ;;  %s200_s20 = scalar_lea.vmem %s1110_s3, %s760_s10 }
  0x12   : > { %828 = vmatprep.mubr.bf16.mxu0 %v909_v4  ;;  %v917_v7 = vld [vmem:[%s1002_s26 + $0x40] sm:$0xff]   ;;  %v918_v11 = vld [vmem:[%s1002_s26 + $0x48] sm:$0xff]   ;;  %v919_v13 = vld [vmem:[%s1002_s26 + $0x50] sm:$0xff]  }
  0x13   : > { %844 = vmatprep.mubr.bf16.mxu1 %v917_v7  ;;  %v912_v14 = vld [vmem:[%s1002_s26 + $0x18] sm:$0xff]   ;;  %v913_v16 = vld [vmem:[%s1002_s26 + $0x20] sm:$0xff]   ;;  %v914_v18 = vld [vmem:[%s1002_s26 + $0x28] sm:$0xff]  }
  0x14   : > { %819 = vmatpush3.bf16.msra.mxu0 %v904_v3  ;;  %871 = vmatpush3.bf16.msra.mxu1 %v904_v3  ;;  %v920_v15 = vld [vmem:[%s1002_s26 + $0x58] sm:$0xff]   ;;  %v921_v17 = vld [vmem:[%s1002_s26 + $0x60] sm:$0xff]   ;;  %v922_v19 = vld [vmem:[%s1002_s26 + $0x68] sm:$0xff]  }
  0x15   : > { %820 = vmatprep.subr.bf16.mxu0 %v905_v5  ;;  %864 = vmatprep.subr.bf16.mxu1 %v905_v5  ;;  %v915_v20 = vld [vmem:[%s1002_s26 + $0x30] sm:$0xff]   ;;  %v916_v22 = vld [vmem:[%s1002_s26 + $0x38] sm:$0xff]  }
  0x16   : > { %v923_v21 = vld [vmem:[%s1002_s26 + $0x70] sm:$0xff]   ;;  %v924_v23 = vld [vmem:[%s1002_s26 + $0x78] sm:$0xff]  }
  0x18   : > { %821 = vmatpush3.bf16.msra.mxu0 %v905_v5  ;;  %872 = vmatpush3.bf16.msra.mxu1 %v905_v5 }
  0x19   : > { %822 = vmatprep.subr.bf16.mxu0 %v906_v6  ;;  %865 = vmatprep.subr.bf16.mxu1 %v906_v6 }
  0x1c   : > { %823 = vmatpush3.bf16.msra.mxu0 %v906_v6  ;;  %873 = vmatpush3.bf16.msra.mxu1 %v906_v6 }
  0x1d   : > { %824 = vmatprep.subr.bf16.mxu0 %v907_v8  ;;  %866 = vmatprep.subr.bf16.mxu1 %v907_v8 }
  0x20   : > { %825 = vmatpush3.bf16.msra.mxu0 %v907_v8  ;;  %874 = vmatpush3.bf16.msra.mxu1 %v907_v8 }
  0x21   : > { %826 = vmatprep.subr.bf16.mxu0 %v908_v9  ;;  %867 = vmatprep.subr.bf16.mxu1 %v908_v9 }
  0x24   : > { %827 = vmatpush3.bf16.msra.mxu0 %v908_v9  ;;  %875 = vmatpush3.bf16.msra.mxu1 %v908_v9 }
  0x27   : > { %829 = vmatmul.mubr.bf16.vlgmr.msra.gmra.mrb[0].mxu0 %v910_v10  ;;  %845 = vmatmul.mubr.bf16.vlgmr.msra.gmra.mrb[0].mxu1 %v918_v11 }
  0x28   : > { %832 = vmatprep.mubr.bf16.mxu0 %v911_v12  ;;  %848 = vmatprep.mubr.bf16.mxu1 %v919_v13 }
  0x2f   : > { %833 = vmatmul.mubr.bf16.gmra.mrb[4].mxu0 %v912_v14  ;;  %849 = vmatmul.mubr.bf16.gmra.mrb[4].mxu1 %v920_v15 }
  0x30   : > { %836 = vmatprep.mubr.bf16.mxu0 %v913_v16  ;;  %852 = vmatprep.mubr.bf16.mxu1 %v921_v17 }
  0x37   : > { %837 = vmatmul.mubr.bf16.gmra.mrb[8].mxu0 %v914_v18  ;;  %853 = vmatmul.mubr.bf16.gmra.mrb[8].mxu1 %v922_v19 }
  0x38   : > { %840 = vmatprep.mubr.bf16.mxu0 %v915_v20  ;;  %856 = vmatprep.mubr.bf16.mxu1 %v923_v21 }
  0x3f   : > { %841 = vmatmul.mubr.bf16.gmra.mrb[12].mxu0 %v916_v22  ;;  %857 = vmatmul.mubr.bf16.gmra.mrb[12].mxu1 %v924_v23 }
  0xfa   : > { %v830_v24 = vpop.f32.mrb[0].mxu0  ;;  %v1035_v25 = vpop.f32.mrb[0].mxu1 }
  0xfb   : > { %v428_v26 = vpop.f32.mrb[1].mxu0  ;;  %v1037_v27 = vpop.f32.mrb[1].mxu1  ;;  %v598_v35 = vmul.f32 %v830_v24, %v830_v24 }
  0xfc   : > { %v831_v28 = vpop.f32.mrb[2].mxu0  ;;  %v1039_v29 = vpop.f32.mrb[2].mxu1  ;;  %v596_v32 = vmul.f32 %v428_v26, %v428_v26 }
  0xfd   : > { %v431_v30 = vpop.f32.mrb[3].mxu0  ;;  %v1041_v31 = vpop.f32.mrb[3].mxu1  ;;  %v599_v38 = vmul.f32 %v831_v28, %v831_v28 }
  0xfe   : > { %v562_v33 = vadd.f32 %v431_v30, %v428_v26  ;;  %v597_v34 = vmul.f32 %v431_v30, %v431_v30 }
 0x100   : > { %v563_v36 = vadd.f32 %v830_v24, %v562_v33  ;;  %v628_v37 = vadd.f32 %v597_v34, %v596_v32 }
 0x102   : > { %v629_v39 = vadd.f32 %v628_v37, %v598_v35  ;;  %v834_v40 = vpop.f32.mrb[4].mxu0  ;;  %v564_v41 = vadd.f32 %v831_v28, %v563_v36  ;;  %v1043_v42 = vpop.f32.mrb[4].mxu1 }
 0x103   : > { %v444_v43 = vpop.f32.mrb[5].mxu0  ;;  %v1045_v44 = vpop.f32.mrb[5].mxu1  ;;  %v602_v55 = vmul.f32 %v834_v40, %v834_v40 }
 0x104   : > { %v565_v45 = vadd.f32 %v564_v41, %v444_v43  ;;  %v600_v46 = vmul.f32 %v444_v43, %v444_v43  ;;  %v630_v47 = vadd.f32 %v629_v39, %v599_v38  ;;  %v835_v48 = vpop.f32.mrb[6].mxu0  ;;  %v1047_v49 = vpop.f32.mrb[6].mxu1  ;;  %v612_v41 = vmul.f32 %v1037_v27, %v1037_v27 }
 0x105   : > { %v447_v50 = vpop.f32.mrb[7].mxu0  ;;  %v1049_v51 = vpop.f32.mrb[7].mxu1  ;;  %v603_v58 = vmul.f32 %v835_v48, %v835_v48 }
 0x106   : > { %v631_v52 = vadd.f32 %v630_v47, %v600_v46  ;;  %v566_v53 = vadd.f32 %v565_v45, %v447_v50  ;;  %v601_v54 = vmul.f32 %v447_v50, %v447_v50  ;;  %v614_v50 = vmul.f32 %v1035_v25, %v1035_v25 }
 0x108   : > { %v567_v56 = vadd.f32 %v834_v40, %v566_v53  ;;  %v632_v57 = vadd.f32 %v631_v52, %v601_v54  ;;  %v615_v54 = vmul.f32 %v1039_v29, %v1039_v29 }
 0x10a   : > { %v633_v59 = vadd.f32 %v632_v57, %v602_v55  ;;  %v838_v60 = vpop.f32.mrb[8].mxu0  ;;  %v568_v61 = vadd.f32 %v835_v48, %v567_v56  ;;  %v1051_v62 = vpop.f32.mrb[8].mxu1  ;;  %v613_v48 = vmul.f32 %v1041_v31, %v1041_v31 }
 0x10b   : > { %v460_v63 = vpop.f32.mrb[9].mxu0  ;;  %v524_v0 = vpop.f32.mrb[9].mxu1  ;;  %v606_v11 = vmul.f32 %v838_v60, %v838_v60 }
 0x10c   : > { %v569_v1 = vadd.f32 %v568_v61, %v460_v63  ;;  %v604_v2 = vmul.f32 %v460_v63, %v460_v63  ;;  %v634_v3 = vadd.f32 %v633_v59, %v603_v58  ;;  %v839_v4 = vpop.f32.mrb[10].mxu0  ;;  %v1053_v5 = vpop.f32.mrb[10].mxu1 }
 0x10d   : > { %v463_v6 = vpop.f32.mrb[11].mxu0  ;;  %v527_v7 = vpop.f32.mrb[11].mxu1  ;;  %v607_v14 = vmul.f32 %v839_v4, %v839_v4 }
 0x10e   : > { %v635_v8 = vadd.f32 %v634_v3, %v604_v2  ;;  %v570_v9 = vadd.f32 %v569_v1, %v463_v6  ;;  %v605_v10 = vmul.f32 %v463_v6, %v463_v6  ;;  %v620_v2 = vmul.f32 %v524_v0, %v524_v0 }
 0x110   : > { %v571_v12 = vadd.f32 %v838_v60, %v570_v9  ;;  %v636_v13 = vadd.f32 %v635_v8, %v605_v10  ;;  %v617_v60 = vmul.f32 %v1049_v51, %v1049_v51  ;;  %v622_v9 = vmul.f32 %v1051_v62, %v1051_v62 }
 0x112   : > { %v637_v15 = vadd.f32 %v636_v13, %v606_v11  ;;  %v842_v16 = vpop.f32.mrb[12].mxu0  ;;  %v572_v17 = vadd.f32 %v839_v4, %v571_v12  ;;  %v1055_v18 = vpop.f32.mrb[12].mxu1  ;;  %v623_v11 = vmul.f32 %v1053_v5, %v1053_v5 }
 0x113   : > { %v476_v19 = vpop.f32.mrb[13].mxu0  ;;  %v540_v20 = vpop.f32.mrb[13].mxu1  ;;  %v610_v35 = vmul.f32 %v842_v16, %v842_v16 }
 0x114   : > { %v573_v21 = vadd.f32 %v572_v17, %v476_v19  ;;  %v608_v22 = vmul.f32 %v476_v19, %v476_v19  ;;  %v638_v23 = vadd.f32 %v637_v15, %v607_v14  ;;  %v843_v24 = vpop.f32.mrb[14].mxu0  ;;  %v859_v26 = vpop.f32.mrb[14].mxu1  ;;  %v624_v13 = vmul.f32 %v540_v20, %v540_v20 }
 0x115   : > { %v479_v28 = vpop.f32.mrb[15].mxu0  ;;  %v543_v30 = vpop.f32.mrb[15].mxu1  ;;  %v611_v38 = vmul.f32 %v843_v24, %v843_v24  ;;  %v626_v17 = vmul.f32 %v1055_v18, %v1055_v18 }
 0x116   : > { %v639_v32 = vadd.f32 %v638_v23, %v608_v22  ;;  %v574_v33 = vadd.f32 %v573_v21, %v479_v28  ;;  %v609_v34 = vmul.f32 %v479_v28, %v479_v28  ;;  %v627_v21 = vmul.f32 %v859_v26, %v859_v26 }
 0x118   : > { %v575_v36 = vadd.f32 %v842_v16, %v574_v33  ;;  %v640_v37 = vadd.f32 %v639_v32, %v609_v34 }
 0x11a   : > { %v641_v39 = vadd.f32 %v640_v37, %v610_v35  ;;  %v576_v40 = vadd.f32 %v843_v24, %v575_v36 }
 0x11c   : > { %v577_v43 = vadd.f32 %v576_v40, %v1037_v27  ;;  %v642_v45 = vadd.f32 %v641_v39, %v611_v38  ;;  %v616_v27 = vmul.f32 %v1045_v44, %v1045_v44 }
 0x11e   : > { %v643_v46 = vadd.f32 %v642_v45, %v612_v41  ;;  %v578_v47 = vadd.f32 %v577_v43, %v1041_v31 }
 0x120   : > { %v579_v52 = vadd.f32 %v1035_v25, %v578_v47  ;;  %v644_v53 = vadd.f32 %v643_v46, %v613_v48  ;;  %v618_v25 = vmul.f32 %v1043_v42, %v1043_v42 }
 0x122   : > { %v645_v55 = vadd.f32 %v644_v53, %v614_v50  ;;  %v580_v56 = vadd.f32 %v1039_v29, %v579_v52  ;;  %v619_v29 = vmul.f32 %v1047_v49, %v1047_v49 }
 0x124   : > { %v581_v57 = vadd.f32 %v580_v56, %v1045_v44  ;;  %v646_v58 = vadd.f32 %v645_v55, %v615_v54 }
 0x126   : > { %v647_v59 = vadd.f32 %v646_v58, %v616_v27  ;;  %v582_v31 = vadd.f32 %v581_v57, %v1049_v51  ;;  %v621_v51 = vmul.f32 %v527_v7, %v527_v7 }
 0x128   : > { %v583_v61 = vadd.f32 %v1043_v42, %v582_v31  ;;  %v648_v63 = vadd.f32 %v647_v59, %v617_v60 }
 0x12a   : > { %v649_v1 = vadd.f32 %v648_v63, %v618_v25  ;;  %v584_v44 = vadd.f32 %v1047_v49, %v583_v61 }
 0x12c   : > { %v585_v3 = vadd.f32 %v584_v44, %v524_v0  ;;  %v650_v4 = vadd.f32 %v649_v1, %v619_v29 }
 0x12e   : > { %v651_v6 = vadd.f32 %v650_v4, %v620_v2  ;;  %v586_v8 = vadd.f32 %v585_v3, %v527_v7  ;;  %v625_v7 = vmul.f32 %v543_v30, %v543_v30 }
 0x130   : > { %v587_v10 = vadd.f32 %v1051_v62, %v586_v8  ;;  %v652_v42 = vadd.f32 %v651_v6, %v621_v51 }
 0x132   : > { %v653_v12 = vadd.f32 %v652_v42, %v622_v9  ;;  %v588_v49 = vadd.f32 %v1053_v5, %v587_v10 }
 0x134   : > { %v589_v14 = vadd.f32 %v588_v49, %v540_v20  ;;  %v654_v0 = vadd.f32 %v653_v12, %v623_v11 }
 0x136   : > { %v655_v15 = vadd.f32 %v654_v0, %v624_v13  ;;  %v590_v16 = vadd.f32 %v589_v14, %v543_v30 }
 0x138   : > { %v591_v62 = vadd.f32 %v1055_v18, %v590_v16  ;;  %v656_v19 = vadd.f32 %v655_v15, %v625_v7 }
 0x13a   : > { %v592_v22 = vadd.f32 %v859_v26, %v591_v62  ;;  %v657_v23 = vadd.f32 %v656_v19, %v626_v17 }
 0x13c   : > { %v658_v5 = vadd.f32 %v657_v23, %v627_v21  ;;  %594 = vst [vmem:[%s196_s17] sm:$0xff] %v592_v22 }
 0x13e   : > { %660 = vst [vmem:[%s200_s20] sm:$0xff] %v658_v5 }
 0x13f PF: > { %s14_s14 = sadd.s32 1, %s947_s14   ;;  %s1111_s12 = smov %s943_s13 }
 0x140   : > { %p11_p6 = scmp.ge.s32.totalorder %s14_s14, 4   ;;  %s1112_s13 = smov %s1114_s15 }
 0x142   :  { %13 = sbr.rel (!%p11_p6) target bundleno = 2 (0x2), region = 74 }

// kernel: upsampler_block.3
= control target key start
LH: loop header
LB: loop body
LE: loop exit
PB: predicated region body
PF: predicated region fallthrough
CT: control target
= control target key end

     0   :  { %s1126_s12 = smov 0   ;;  %s1247_s0 = inlined_call_operand.vmem [shape: bf16[512,128], index: 0, kind: input, shape index: {}]   ;;  %s1248_s1 = inlined_call_operand.vmem [shape: bf16[128,128], index: 1, kind: input, shape index: {}]   ;;  %s1249_s2 = inlined_call_operand.vmem [shape: f32[1,128], index: 2, kind: input, shape index: {}]   ;;  %s1250_s3 = inlined_call_operand.vmem [shape: bf16[512,128], index: 3, kind: output, shape index: {}]  }
   0x1 LB: > { %s783_s13 = sadd.s32 4294967295, %s1104_s12   ;;  %p787_p0 = scmp.ge.s32.totalorder %s1104_s12, 1  ;;  %s1104_s12 = sphi %s1126_s12, %s13_s12  }
   0x2   : > { %p138_p1 = scmp.lt.s32.totalorder %s1104_s12, 3 }
   0x4   : > { %p139_p2 = pnand %p787_p0, %p138_p1 }
   0x5   : > { %v1074_v0 = vld [vmem:[%s1248_s1] sm:$0xff] (!%p139_p2)   ;;  %s788_s16 = sshll.u32 (!%p139_p2), %s783_s13, 5  ;;  %v1075_v1 = vld [vmem:[%s1248_s1 + $0x8] sm:$0xff] (!%p139_p2)   ;;  %v1076_v2 = vld [vmem:[%s1248_s1 + $0x10] sm:$0xff] (!%p139_p2)  }
   0x6   : > { %142 = sbr.rel (%p139_p2) target bundleno = 284 (0x11c), region = 32  ;;  %p163_p3 = scmp.lt.s32.totalorder (!%p139_p2), %s788_s16, 63  ;;  %1002 = vmatprep.subr.bf16.mxu0 (!%p139_p2), %v1074_v0  ;;  %1050 = vmatprep.subr.bf16.mxu1 (!%p139_p2), %v1074_v0  ;;  %v1077_v3 = vld [vmem:[%s1248_s1 + $0x18] sm:$0xff] (!%p139_p2)   ;;  %v1078_v6 = vld [vmem:[%s1248_s1 + $0x20] sm:$0xff] (!%p139_p2)   ;;  %v1079_v7 = vld [vmem:[%s1248_s1 + $0x28] sm:$0xff] (!%p139_p2)  }
   0x7   : > { %1003 = vmatpush3.bf16.msra.mxu0 (!%p139_p2), %v1074_v0  ;;  %1058 = vmatpush3.bf16.msra.mxu1 (!%p139_p2), %v1074_v0  ;;  %v1080_v8 = vld [vmem:[%s1248_s1 + $0x30] sm:$0xff] (!%p139_p2)   ;;  %v1081_v9 = vld [vmem:[%s1248_s1 + $0x38] sm:$0xff] (!%p139_p2)   ;;  %v1187_v24 = vld [vmem:[%s1249_s2] ss:$0 sm:$0xff] (!%p139_p2) }
   0x8   : > { %1004 = vmatprep.subr.bf16.mxu0 (!%p139_p2), %v1075_v1  ;;  %1051 = vmatprep.subr.bf16.mxu1 (!%p139_p2), %v1075_v1 }
   0xb   : > { %1005 = vmatpush3.bf16.msra.mxu0 (!%p139_p2), %v1075_v1  ;;  %1059 = vmatpush3.bf16.msra.mxu1 (!%p139_p2), %v1075_v1 }
   0xc   : > { %1006 = vmatprep.subr.bf16.mxu0 (!%p139_p2), %v1076_v2  ;;  %1052 = vmatprep.subr.bf16.mxu1 (!%p139_p2), %v1076_v2 }
   0xd   : > { %s1252_s16 = smov (!%p163_p3, %s788_s16), 63 }
   0xe   : > { %s789_s21 = sshll.u32 %s1252_s16, 2 }
   0xf   : > { %s1151_s24 = scalar_lea.vmem %s1247_s0, %s789_s21  ;;  %1007 = vmatpush3.bf16.msra.mxu0 %v1076_v2  ;;  %1060 = vmatpush3.bf16.msra.mxu1 %v1076_v2  ;;  %s1202_s13 = scalar_lea.vmem %s1250_s3, %s789_s21 }
  0x10   : > { %v1082_v4 = vld [vmem:[%s1151_s24] sm:$0xff]   ;;  %1008 = vmatprep.subr.bf16.mxu0 %v1077_v3  ;;  %1053 = vmatprep.subr.bf16.mxu1 %v1077_v3  ;;  %v1084_v10 = vld [vmem:[%s1151_s24 + $0x8] sm:$0xff]   ;;  %v1086_v12 = vld [vmem:[%s1151_s24 + $0x10] sm:$0xff]  }
  0x11   : > { %v1083_v5 = vld [vmem:[%s1151_s24 + $0x40] sm:$0xff]   ;;  %1018 = vmatprep.mubr.bf16.mxu0 %v1082_v4  ;;  %v1085_v11 = vld [vmem:[%s1151_s24 + $0x48] sm:$0xff]   ;;  %v1087_v13 = vld [vmem:[%s1151_s24 + $0x50] sm:$0xff]  }
  0x12   : > { %1034 = vmatprep.mubr.bf16.mxu1 %v1083_v5  ;;  %v1088_v14 = vld [vmem:[%s1151_s24 + $0x18] sm:$0xff]   ;;  %v1090_v16 = vld [vmem:[%s1151_s24 + $0x20] sm:$0xff]   ;;  %v1092_v18 = vld [vmem:[%s1151_s24 + $0x28] sm:$0xff]  }
  0x13   : > { %1009 = vmatpush3.bf16.msra.mxu0 %v1077_v3  ;;  %1061 = vmatpush3.bf16.msra.mxu1 %v1077_v3  ;;  %v1089_v15 = vld [vmem:[%s1151_s24 + $0x58] sm:$0xff]   ;;  %v1091_v17 = vld [vmem:[%s1151_s24 + $0x60] sm:$0xff]   ;;  %v1093_v19 = vld [vmem:[%s1151_s24 + $0x68] sm:$0xff]  }
  0x14   : > { %1010 = vmatprep.subr.bf16.mxu0 %v1078_v6  ;;  %1054 = vmatprep.subr.bf16.mxu1 %v1078_v6  ;;  %v1094_v20 = vld [vmem:[%s1151_s24 + $0x30] sm:$0xff]   ;;  %v1096_v22 = vld [vmem:[%s1151_s24 + $0x38] sm:$0xff]  }
  0x15   : > { %v1095_v21 = vld [vmem:[%s1151_s24 + $0x70] sm:$0xff]   ;;  %v1097_v23 = vld [vmem:[%s1151_s24 + $0x78] sm:$0xff]  }
  0x17   : > { %1011 = vmatpush3.bf16.msra.mxu0 %v1078_v6  ;;  %1062 = vmatpush3.bf16.msra.mxu1 %v1078_v6 }
  0x18   : > { %1012 = vmatprep.subr.bf16.mxu0 %v1079_v7  ;;  %1055 = vmatprep.subr.bf16.mxu1 %v1079_v7 }
  0x1b   : > { %1013 = vmatpush3.bf16.msra.mxu0 %v1079_v7  ;;  %1063 = vmatpush3.bf16.msra.mxu1 %v1079_v7 }
  0x1c   : > { %1014 = vmatprep.subr.bf16.mxu0 %v1080_v8  ;;  %1056 = vmatprep.subr.bf16.mxu1 %v1080_v8 }
  0x1f   : > { %1015 = vmatpush3.bf16.msra.mxu0 %v1080_v8  ;;  %1064 = vmatpush3.bf16.msra.mxu1 %v1080_v8 }
  0x20   : > { %1016 = vmatprep.subr.bf16.mxu0 %v1081_v9  ;;  %1057 = vmatprep.subr.bf16.mxu1 %v1081_v9 }
  0x23   : > { %1017 = vmatpush3.bf16.msra.mxu0 %v1081_v9  ;;  %1065 = vmatpush3.bf16.msra.mxu1 %v1081_v9 }
  0x26   : > { %1019 = vmatmul.mubr.bf16.vlgmr.msra.gmra.mrb[0].mxu0 %v1084_v10  ;;  %1035 = vmatmul.mubr.bf16.vlgmr.msra.gmra.mrb[0].mxu1 %v1085_v11 }
  0x27   : > { %1022 = vmatprep.mubr.bf16.mxu0 %v1086_v12  ;;  %1038 = vmatprep.mubr.bf16.mxu1 %v1087_v13 }
  0x2e   : > { %1023 = vmatmul.mubr.bf16.gmra.mrb[4].mxu0 %v1088_v14  ;;  %1039 = vmatmul.mubr.bf16.gmra.mrb[4].mxu1 %v1089_v15 }
  0x2f   : > { %1026 = vmatprep.mubr.bf16.mxu0 %v1090_v16  ;;  %1042 = vmatprep.mubr.bf16.mxu1 %v1091_v17 }
  0x36   : > { %1027 = vmatmul.mubr.bf16.gmra.mrb[8].mxu0 %v1092_v18  ;;  %1043 = vmatmul.mubr.bf16.gmra.mrb[8].mxu1 %v1093_v19 }
  0x37   : > { %1030 = vmatprep.mubr.bf16.mxu0 %v1094_v20  ;;  %1046 = vmatprep.mubr.bf16.mxu1 %v1095_v21 }
  0x3e   : > { %1031 = vmatmul.mubr.bf16.gmra.mrb[12].mxu0 %v1096_v22  ;;  %1047 = vmatmul.mubr.bf16.gmra.mrb[12].mxu1 %v1097_v23 }
  0xf9   : > { %v1020_v25 = vpop.f32.mrb[0].mxu0  ;;  %v1036_v26 = vpop.f32.mrb[0].mxu1 }
  0xfa   : > { %v417_v27 = vadd.f32 %v1020_v25, %v1187_v24  ;;  %v481_v28 = vadd.f32 %v1036_v26, %v1187_v24  ;;  %v408_v29 = vpop.f32.mrb[1].mxu0  ;;  %v472_v30 = vpop.f32.mrb[1].mxu1 }
  0xfb   : > { %v409_v31 = vadd.f32 %v1187_v24, %v408_v29  ;;  %v473_v32 = vadd.f32 %v1187_v24, %v472_v30  ;;  %v1021_v33 = vpop.f32.mrb[2].mxu0  ;;  %v1037_v34 = vpop.f32.mrb[2].mxu1 }
  0xfc   : > { %v420_v35 = vadd.f32 %v1021_v33, %v1187_v24  ;;  %v484_v36 = vadd.f32 %v1037_v34, %v1187_v24  ;;  %v411_v37 = vpop.f32.mrb[3].mxu0  ;;  %v475_v38 = vpop.f32.mrb[3].mxu1  ;;  %v537_v41 = vmax.f32 %v417_v27, 0.0  ;;  %v553_v42 = vmax.f32 %v481_v28, 0.0 }
  0xfd   : > { %v412_v39 = vadd.f32 %v1187_v24, %v411_v37  ;;  %v476_v40 = vadd.f32 %v1187_v24, %v475_v38  ;;  %v535_v45 = vmax.f32 %v409_v31, 0.0  ;;  %v551_v46 = vmax.f32 %v473_v32, 0.0 }
  0xfe   : > { %v538_v43 = vmax.f32 %v420_v35, 0.0  ;;  %v554_v44 = vmax.f32 %v484_v36, 0.0 }
  0xff   : > { %v536_v47 = vmax.f32 %v412_v39, 0.0  ;;  %v552_v48 = vmax.f32 %v476_v40, 0.0 }
 0x100   : > { %v891_v49 = vpack.c.bf16 %v538_v43, %v537_v41  ;;  %v931_v50 = vpack.c.bf16 %v554_v44, %v553_v42 }
 0x101   : > { %v886_v51 = vpack.c.bf16 %v536_v47, %v535_v45  ;;  %v926_v52 = vpack.c.bf16 %v552_v48, %v551_v46  ;;  %v1024_v53 = vpop.f32.mrb[4].mxu0  ;;  %v1040_v54 = vpop.f32.mrb[4].mxu1 }
 0x102   : > { %963 = vst [vmem:[%s1202_s13 + $0x8] sm:$0xff] %v891_v49   ;;  %971 = vst [vmem:[%s1202_s13 + $0x48] sm:$0xff] %v931_v50   ;;  %v433_v55 = vadd.f32 %v1024_v53, %v1187_v24  ;;  %v497_v56 = vadd.f32 %v1040_v54, %v1187_v24  ;;  %v424_v57 = vpop.f32.mrb[5].mxu0  ;;  %v488_v58 = vpop.f32.mrb[5].mxu1 }
 0x103   : > { %887 = vst [vmem:[%s1202_s13] sm:$0xff] %v886_v51   ;;  %970 = vst [vmem:[%s1202_s13 + $0x40] sm:$0xff] %v926_v52   ;;  %v425_v59 = vadd.f32 %v1187_v24, %v424_v57  ;;  %v489_v60 = vadd.f32 %v1187_v24, %v488_v58  ;;  %v1025_v61 = vpop.f32.mrb[6].mxu0  ;;  %v1041_v62 = vpop.f32.mrb[6].mxu1 }
 0x104   : > { %v436_v63 = vadd.f32 %v1025_v61, %v1187_v24  ;;  %v500_v0 = vadd.f32 %v1041_v62, %v1187_v24  ;;  %v427_v1 = vpop.f32.mrb[7].mxu0  ;;  %v491_v2 = vpop.f32.mrb[7].mxu1  ;;  %v541_v5 = vmax.f32 %v433_v55, 0.0  ;;  %v557_v6 = vmax.f32 %v497_v56, 0.0 }
 0x105   : > { %v428_v3 = vadd.f32 %v1187_v24, %v427_v1  ;;  %v492_v4 = vadd.f32 %v1187_v24, %v491_v2  ;;  %v539_v9 = vmax.f32 %v425_v59, 0.0  ;;  %v555_v10 = vmax.f32 %v489_v60, 0.0 }
 0x106   : > { %v542_v7 = vmax.f32 %v436_v63, 0.0  ;;  %v558_v8 = vmax.f32 %v500_v0, 0.0 }
 0x107   : > { %v540_v11 = vmax.f32 %v428_v3, 0.0  ;;  %v556_v12 = vmax.f32 %v492_v4, 0.0 }
 0x108   : > { %v901_v13 = vpack.c.bf16 %v542_v7, %v541_v5  ;;  %v941_v14 = vpack.c.bf16 %v558_v8, %v557_v6 }
 0x109   : > { %v896_v15 = vpack.c.bf16 %v540_v11, %v539_v9  ;;  %v936_v16 = vpack.c.bf16 %v556_v12, %v555_v10  ;;  %v1028_v17 = vpop.f32.mrb[8].mxu0  ;;  %v1044_v18 = vpop.f32.mrb[8].mxu1 }
 0x10a   : > { %965 = vst [vmem:[%s1202_s13 + $0x18] sm:$0xff] %v901_v13   ;;  %973 = vst [vmem:[%s1202_s13 + $0x58] sm:$0xff] %v941_v14   ;;  %v449_v19 = vadd.f32 %v1028_v17, %v1187_v24  ;;  %v513_v20 = vadd.f32 %v1044_v18, %v1187_v24  ;;  %v440_v21 = vpop.f32.mrb[9].mxu0  ;;  %v504_v22 = vpop.f32.mrb[9].mxu1 }
 0x10b   : > { %964 = vst [vmem:[%s1202_s13 + $0x10] sm:$0xff] %v896_v15   ;;  %972 = vst [vmem:[%s1202_s13 + $0x50] sm:$0xff] %v936_v16   ;;  %v441_v23 = vadd.f32 %v1187_v24, %v440_v21  ;;  %v505_v25 = vadd.f32 %v1187_v24, %v504_v22  ;;  %v1029_v26 = vpop.f32.mrb[10].mxu0  ;;  %v1045_v27 = vpop.f32.mrb[10].mxu1 }
 0x10c   : > { %v452_v28 = vadd.f32 %v1029_v26, %v1187_v24  ;;  %v516_v29 = vadd.f32 %v1045_v27, %v1187_v24  ;;  %v443_v30 = vpop.f32.mrb[11].mxu0  ;;  %v507_v31 = vpop.f32.mrb[11].mxu1  ;;  %v545_v34 = vmax.f32 %v449_v19, 0.0  ;;  %v561_v35 = vmax.f32 %v513_v20, 0.0 }
 0x10d   : > { %v444_v32 = vadd.f32 %v1187_v24, %v443_v30  ;;  %v508_v33 = vadd.f32 %v1187_v24, %v507_v31  ;;  %v543_v38 = vmax.f32 %v441_v23, 0.0  ;;  %v559_v39 = vmax.f32 %v505_v25, 0.0 }
 0x10e   : > { %v546_v36 = vmax.f32 %v452_v28, 0.0  ;;  %v562_v37 = vmax.f32 %v516_v29, 0.0 }
 0x10f   : > { %v544_v40 = vmax.f32 %v444_v32, 0.0  ;;  %v560_v41 = vmax.f32 %v508_v33, 0.0 }
 0x110   : > { %v911_v42 = vpack.c.bf16 %v546_v36, %v545_v34  ;;  %v951_v43 = vpack.c.bf16 %v562_v37, %v561_v35 }
 0x111   : > { %v906_v44 = vpack.c.bf16 %v544_v40, %v543_v38  ;;  %v946_v45 = vpack.c.bf16 %v560_v41, %v559_v39  ;;  %v1032_v46 = vpop.f32.mrb[12].mxu0  ;;  %v1048_v47 = vpop.f32.mrb[12].mxu1 }
 0x112   : > { %967 = vst [vmem:[%s1202_s13 + $0x28] sm:$0xff] %v911_v42   ;;  %975 = vst [vmem:[%s1202_s13 + $0x68] sm:$0xff] %v951_v43   ;;  %v465_v48 = vadd.f32 %v1032_v46, %v1187_v24  ;;  %v529_v49 = vadd.f32 %v1048_v47, %v1187_v24  ;;  %v456_v50 = vpop.f32.mrb[13].mxu0  ;;  %v520_v51 = vpop.f32.mrb[13].mxu1 }
 0x113   : > { %966 = vst [vmem:[%s1202_s13 + $0x20] sm:$0xff] %v906_v44   ;;  %974 = vst [vmem:[%s1202_s13 + $0x60] sm:$0xff] %v946_v45   ;;  %v457_v52 = vadd.f32 %v1187_v24, %v456_v50  ;;  %v521_v53 = vadd.f32 %v1187_v24, %v520_v51  ;;  %v1033_v54 = vpop.f32.mrb[14].mxu0  ;;  %v1049_v55 = vpop.f32.mrb[14].mxu1 }
 0x114   : > { %v468_v56 = vadd.f32 %v1033_v54, %v1187_v24  ;;  %v532_v57 = vadd.f32 %v1049_v55, %v1187_v24  ;;  %v459_v58 = vpop.f32.mrb[15].mxu0  ;;  %v523_v59 = vpop.f32.mrb[15].mxu1  ;;  %v549_v62 = vmax.f32 %v465_v48, 0.0  ;;  %v565_v63 = vmax.f32 %v529_v49, 0.0 }
 0x115   : > { %v460_v60 = vadd.f32 %v1187_v24, %v459_v58  ;;  %v524_v61 = vadd.f32 %v1187_v24, %v523_v59  ;;  %v547_v2 = vmax.f32 %v457_v52, 0.0  ;;  %v563_v3 = vmax.f32 %v521_v53, 0.0 }
 0x116   : > { %v550_v0 = vmax.f32 %v468_v56, 0.0  ;;  %v566_v1 = vmax.f32 %v532_v57, 0.0 }
 0x117   : > { %v548_v4 = vmax.f32 %v460_v60, 0.0  ;;  %v564_v5 = vmax.f32 %v524_v61, 0.0 }
 0x118   : > { %v921_v6 = vpack.c.bf16 %v550_v0, %v549_v62  ;;  %v961_v7 = vpack.c.bf16 %v566_v1, %v565_v63 }
 0x119   : > { %v916_v8 = vpack.c.bf16 %v548_v4, %v547_v2  ;;  %v956_v9 = vpack.c.bf16 %v564_v5, %v563_v3 }
 0x11a   : > { %969 = vst [vmem:[%s1202_s13 + $0x38] sm:$0xff] %v921_v6   ;;  %977 = vst [vmem:[%s1202_s13 + $0x78] sm:$0xff] %v961_v7  }
 0x11b   : > { %968 = vst [vmem:[%s1202_s13 + $0x30] sm:$0xff] %v916_v8   ;;  %976 = vst [vmem:[%s1202_s13 + $0x70] sm:$0xff] %v956_v9  }
 0x11c PF: > { %s13_s12 = sadd.s32 1, %s1104_s12  }
 0x11d   : > { %p10_p4 = scmp.ge.s32.totalorder %s13_s12, 4  }
 0x11f   :  { %12 = sbr.rel (!%p10_p4) target bundleno = 1 (0x1), region = 62 }

</bundles_post_ra>
